<compile_context>
chip_gen: v6e
topology: v6e:2x2x1
jax: 0.10.0
libtpu: 0.0.40
codegen_flags: <defaults>
</compile_context>

<pallas_src>
import functools

import jax
import jax.numpy as jnp
from jax.experimental import pallas as pl
from jax.experimental.pallas import tpu as pltpu


def _round_up(x, m):
    return (x + m - 1) // m * m


def _padded_vmem_bytes(shape, dtype):
    """VMEM bytes of an array once its minor two dims are padded to the
    hardware tile: (8,128) for 4-byte, (16,128) for 2-byte dtypes."""
    isz = jnp.dtype(dtype).itemsize
    sub = 8 * (4 // isz) if isz <= 4 else 8
    dims = (1, 1) + tuple(int(d) for d in shape)
    lead = 1
    for d in dims[:-2]:
        lead *= d
    return lead * _round_up(dims[-2], sub) * _round_up(dims[-1], 128) * isz


def _attention_kernel(dec_ref, enc_ref, wdec_ref, wenc_ref, bias_ref,
                      out_ref, scores_ref, *, src_len, src_chunk):
    # dec_ref    : (TB, D_dec)        decoder hidden, this batch tile
    # enc_ref    : (S, TB, 2E)        encoder outputs, native src-major layout
    # wdec_ref   : (D_dec, A)         decoder half of the attn Linear weight
    # wenc_ref   : (2E, A)            encoder half of the attn Linear weight
    # bias_ref   : (1, A)             bias, float32
    # out_ref    : (TB, SP)           softmax weights; SP = round_up(S, 128)
    # scores_ref : (SP, TB) float32   raw-score accumulator (src-major scratch)
    TB = dec_ref.shape[0]
    SP = out_ref.shape[-1]

    # ---- Linear(concat([dec, enc])) = dec @ W_dec + enc @ W_enc + b ---------
    # Decoder projection + bias: once per batch tile (hoisted out of the src
    # stream); a single small MXU push with f32 accumulation.
    proj_dec = jnp.dot(dec_ref[...], wdec_ref[...],
                       preferred_element_type=jnp.float32) + bias_ref[...]   # (TB, A)

    # Padded tail rows [src_len, SP) of the scratch are never written below;
    # zero them once (they are masked again before the softmax anyway).
    scores_ref[...] = jnp.zeros_like(scores_ref)

    # Encoder projection + tanh, streamed per (src_chunk, one batch row): the
    # live f32 (chunk, A) intermediates stay small and no tanh is ever spent
    # on padded src positions.  All slice starts/sizes are static.
    for b in range(TB):                                    # static; TB is small
        pdec_b = proj_dec[b:b + 1, :]                      # (1, A)
        for s0 in range(0, src_len, src_chunk):            # static chunk starts
            sz = min(src_chunk, src_len - s0)
            enc_cb = enc_ref[s0:s0 + sz, b, :]             # (sz, 2E)
            proj = jnp.dot(enc_cb, wenc_ref[...],
                           preferred_element_type=jnp.float32)               # (sz, A)
            energy = jnp.tanh(proj + pdec_b)                                 # (sz, A) f32
            scores_ref[s0:s0 + sz, b:b + 1] = jnp.sum(energy, axis=-1,
                                                      keepdims=True)

    # ---- softmax over src (lane axis), lane-dense store ---------------------
    # Only the tiny (SP, TB) score tile is relaid out; the enc stream is not.
    scores = jnp.transpose(scores_ref[...])                                  # (TB, SP)
    col = jax.lax.broadcasted_iota(jnp.int32, (TB, SP), 1)
    valid = col < src_len
    scores = jnp.where(valid, scores, -1e30)

    m = jnp.max(scores, axis=-1, keepdims=True)
    e = jnp.where(valid, jnp.exp(scores - m), 0.0)
    denom = jnp.sum(e, axis=-1, keepdims=True)
    out_ref[...] = (e / denom).astype(out_ref.dtype)       # exact normalization


def attention_forward(decoder_hidden, encoder_outputs, weight, bias, *,
                      compute_dtype=jnp.bfloat16, batch_tile=None,
                      src_chunk=1024, vmem_cap_bytes=48 << 20):
    """Forward of the PyTorch `Attention` module.

    decoder_hidden  : [B, dec_hid_dim]
    encoder_outputs : [src_len, B, 2*enc_hid_dim]   (native PyTorch layout)
    weight          : [attn_dim, 2*enc_hid_dim + dec_hid_dim]  (nn.Linear)
    bias            : [attn_dim]
    returns         : [B, src_len] float32 softmax attention weights

    compute_dtype defaults to bfloat16 for the streamed operands (halves HBM
    traffic on the dominant encoder stream); accumulation / tanh / softmax are
    float32.  If encoder_outputs already arrives as bf16 the cast is a no-op
    (keep it bf16 upstream so no extra pass over the tensor is added).
    vmem_cap_bytes=48 MiB is safe on v7x (64 MiB/TC); raise it on v5e/v6e
    (128 MiB) to grow batch_tile and amortize per-grid-step overhead.
    """
    S, B, E2 = encoder_outputs.shape
    D_dec = decoder_hidden.shape[-1]
    A, attn_in = weight.shape
    assert attn_in == E2 + D_dec
    assert decoder_hidden.shape == (B, D_dec)
    assert bias.shape == (A,)

    # ---- small glue in plain JAX (weights only; enc is NOT copied/relaid) ---
    w_t = weight.astype(compute_dtype).T                 # (attn_in, A)
    w_dec = w_t[:D_dec, :]                               # (D_dec, A)
    w_enc = w_t[D_dec:, :]                               # (2E, A)
    bias2d = bias.reshape(1, A).astype(jnp.float32)
    dec = decoder_hidden.astype(compute_dtype)
    enc = encoder_outputs.astype(compute_dtype)          # no-op if already bf16

    # ---- batch tiling --------------------------------------------------------
    if batch_tile is None:
        # Whole batch in one tile when tiny; otherwise sublane-aligned 8-row
        # tiles so the "parallel" batch axis has >=2 steps (v7x megacore) and
        # the per-tile enc slab stays bounded.
        batch_tile = B if B <= 8 else 8
    TB = batch_tile
    if TB == B:
        B_pad = B
    else:
        if TB % 8 != 0:
            raise ValueError("batch_tile must equal B or be a multiple of 8")
        B_pad = _round_up(B, TB)
        if B_pad != B:
            # Only hit when B is not a multiple of the tile: pads the big enc
            # tensor (one extra copy).  Keep B % batch_tile == 0 (or B <= 8)
            # for the zero-copy path.
            enc = jnp.pad(enc, ((0, 0), (0, B_pad - B), (0, 0)))
            dec = jnp.pad(dec, ((0, B_pad - B), (0, 0)))
    n_tiles = B_pad // TB

    SP = _round_up(S, 128)                               # lane-dense output width
    chunk = max(1, min(src_chunk, S))

    # ---- VMEM budget (accounts for (sublane, lane) tile padding) ------------
    per_step = (_padded_vmem_bytes((S, TB, E2), compute_dtype)     # enc tile
                + _padded_vmem_bytes((TB, D_dec), compute_dtype)   # dec tile
                + _padded_vmem_bytes((TB, SP), jnp.float32))       # out tile
    resident = (_padded_vmem_bytes((D_dec, A), compute_dtype)
                + _padded_vmem_bytes((E2, A), compute_dtype)
                + _padded_vmem_bytes((1, A), jnp.float32)
                + _padded_vmem_bytes((SP, TB), jnp.float32))       # scores scratch
    interm = 3 * _padded_vmem_bytes((chunk, A), jnp.float32)
    vmem_need = 2 * per_step + 2 * resident + interm
    if vmem_need + (2 << 20) > vmem_cap_bytes:
        raise ValueError(
            f"attention tile needs ~{vmem_need >> 20} MiB VMEM; reduce "
            "batch_tile / src_chunk or raise vmem_cap_bytes")
    vmem_limit = int(min(vmem_cap_bytes, max(vmem_need + (4 << 20), 16 << 20)))

    grid_spec = pltpu.PrefetchScalarGridSpec(
        num_scalar_prefetch=0,
        grid=(n_tiles,),
        in_specs=[
            pl.BlockSpec((TB, D_dec), lambda i: (i, 0)),
            # Native (src, batch, feature) layout: only the batch axis is tiled.
            pl.BlockSpec((S, TB, E2), lambda i: (0, i, 0)),
            # Constant block index: weights/bias stay resident in VMEM across
            # grid steps (no re-DMA).  pl.Buffered(1) would additionally drop
            # their second pipeline buffer; omitted here for portability.
            pl.BlockSpec((D_dec, A), lambda i: (0, 0)),
            pl.BlockSpec((E2, A), lambda i: (0, 0)),
            pl.BlockSpec((1, A), lambda i: (0, 0)),
        ],
        out_specs=pl.BlockSpec((TB, SP), lambda i: (i, 0)),
        scratch_shapes=[pltpu.VMEM((SP, TB), jnp.float32)],
    )

    out_padded = pl.pallas_call(
        functools.partial(_attention_kernel, src_len=S, src_chunk=chunk),
        out_shape=jax.ShapeDtypeStruct((B_pad, SP), jnp.float32),
        grid_spec=grid_spec,
        compiler_params=pltpu.CompilerParams(
            dimension_semantics=("parallel",),   # batch tiles shard across TCs
            vmem_limit_bytes=vmem_limit),
    )(dec, enc, w_dec, w_enc, bias2d)

    return out_padded[:B, :S]


def attention_reference(decoder_hidden, encoder_outputs, weight, bias):
    """Pure-JAX reference mirroring the PyTorch forward exactly."""
    S = encoder_outputs.shape[0]
    dec = jnp.repeat(decoder_hidden[:, None, :], S, axis=1)        # (B, S, D_dec)
    enc = jnp.transpose(encoder_outputs, (1, 0, 2))                # (B, S, 2E)
    cat = jnp.concatenate([dec, enc], axis=2)                      # (B, S, attn_in)
    energy = jnp.tanh(cat @ weight.T + bias)                       # (B, S, A)
    attention = jnp.sum(energy, axis=2)                            # (B, S)
    return jax.nn.softmax(attention, axis=1)


if __name__ == "__main__":
    # Small shapes consistent with the module.
    enc_hid_dim = 16
    dec_hid_dim = 32
    attn_dim = 32
    src_len = 8
    batch = 2
    attn_in = 2 * enc_hid_dim + dec_hid_dim

    key = jax.random.PRNGKey(0)
    k_dec, k_enc, k_w, k_b = jax.random.split(key, 4)

    decoder_hidden = jax.random.normal(k_dec, (batch, dec_hid_dim), jnp.float32)
    encoder_outputs = jax.random.normal(
        k_enc, (src_len, batch, 2 * enc_hid_dim), jnp.float32)

    # Deterministic nn.Linear-style init: U(-1/sqrt(fan_in), 1/sqrt(fan_in)).
    bound = 1.0 / (attn_in ** 0.5)
    weight = jax.random.uniform(k_w, (attn_dim, attn_in), jnp.float32,
                                minval=-bound, maxval=bound)
    bias = jax.random.uniform(k_b, (attn_dim,), jnp.float32,
                              minval=-bound, maxval=bound)

    ref = attention_reference(decoder_hidden, encoder_outputs, weight, bias)

    # float32 path: tight check against the reference.
    out_f32 = attention_forward(decoder_hidden, encoder_outputs, weight, bias,
                                compute_dtype=jnp.float32)
    out_f32 = jax.block_until_ready(out_f32)
    assert out_f32.shape == (batch, src_len)
    assert jnp.allclose(out_f32, ref, atol=1e-3, rtol=1e-3), "f32 mismatch vs reference"
    assert jnp.allclose(jnp.sum(out_f32, axis=1), 1.0, atol=1e-3), "f32 rows must sum to 1"

    # Default bfloat16 streaming path (f32 accumulation / softmax).
    out_bf16 = attention_forward(decoder_hidden, encoder_outputs, weight, bias)
    out_bf16 = jax.block_until_ready(out_bf16)
    assert out_bf16.shape == (batch, src_len)
    # Loose check vs. the f32 reference (bf16 input quantization is baked in)...
    assert jnp.allclose(out_bf16, ref, atol=5e-2, rtol=5e-2), "bf16 mismatch vs f32 ref"
    # ...and a tighter check vs. a reference fed the same bf16-rounded inputs.
    ref_bf16 = attention_reference(
        decoder_hidden.astype(jnp.bfloat16).astype(jnp.float32),
        encoder_outputs.astype(jnp.bfloat16).astype(jnp.float32),
        weight.astype(jnp.bfloat16).astype(jnp.float32), bias)
    assert jnp.allclose(out_bf16, ref_bf16, atol=2e-2, rtol=2e-2), "bf16 kernel mismatch"
    assert jnp.allclose(jnp.sum(out_bf16, axis=1), 1.0, atol=1e-3), "bf16 rows must sum to 1"

    print("KERNEL_OK")
</pallas_src>

<mosaic_0001>
module attributes {stable_mosaic.version = 11 : i64} {
  func.func @_attention_kernel(%arg0: i32, %arg1: memref<2x32xf32, #tpu.memory_space<vmem>>, %arg2: memref<8x2x32xf32, #tpu.memory_space<vmem>>, %arg3: memref<32x32xf32, #tpu.memory_space<vmem>>, %arg4: memref<32x32xf32, #tpu.memory_space<vmem>>, %arg5: memref<1x32xf32, #tpu.memory_space<vmem>>, %arg6: memref<2x128xf32, #tpu.memory_space<vmem>>, %arg7: memref<128x2xf32, #tpu.memory_space<vmem>>) attributes {dimension_semantics = [#tpu.dimension_semantics<parallel>], iteration_bounds = array<i64: 1>, scalar_prefetch = 0 : i64, scratch_operands = 1 : i64, tpu.core_type = #tpu.core_type<tc>, window_params = [{transform_indices = @transform_0, window_bounds = array<i64: 2, 32>}, {transform_indices = @transform_1, window_bounds = array<i64: 8, 2, 32>}, {pipeline_mode = #tpu.pipeline_mode<synchronous>, transform_indices = @transform_2, window_bounds = array<i64: 32, 32>}, {pipeline_mode = #tpu.pipeline_mode<synchronous>, transform_indices = @transform_3, window_bounds = array<i64: 32, 32>}, {pipeline_mode = #tpu.pipeline_mode<synchronous>, transform_indices = @transform_4, window_bounds = array<i64: 1, 32>}, {transform_indices = @transform_5, window_bounds = array<i64: 2, 128>}]} {
    %c0 = arith.constant 0 : index
    %c0_0 = arith.constant 0 : index
    %0 = vector.load %arg1[%c0, %c0_0] : memref<2x32xf32, #tpu.memory_space<vmem>>, vector<2x32xf32>
    %c0_1 = arith.constant 0 : index
    %c0_2 = arith.constant 0 : index
    %1 = vector.load %arg3[%c0_1, %c0_2] : memref<32x32xf32, #tpu.memory_space<vmem>>, vector<32x32xf32>
    %cst = arith.constant dense<0.000000e+00> : vector<2x32xf32>
    %2 = tpu.matmul %0, %1, %cst {dimension_numbers = #tpu.dot_dimension_numbers<[1], [0], [0], [1], [0, 0, 1, 1], [], []>} : vector<2x32xf32>, vector<32x32xf32>, vector<2x32xf32> -> vector<2x32xf32>
    %c0_3 = arith.constant 0 : index
    %c0_4 = arith.constant 0 : index
    %3 = vector.load %arg5[%c0_3, %c0_4] : memref<1x32xf32, #tpu.memory_space<vmem>>, vector<1x32xf32>
    %4 = vector.broadcast %3 : vector<1x32xf32> to vector<2x32xf32>
    %5 = arith.addf %2, %4 : vector<2x32xf32>
    %cst_5 = arith.constant 0.000000e+00 : f32
    %6 = vector.broadcast %cst_5 : f32 to vector<128x2xf32>
    %c0_6 = arith.constant 0 : index
    %c0_7 = arith.constant 0 : index
    %7 = vector.load %arg7[%c0_6, %c0_7] : memref<128x2xf32, #tpu.memory_space<vmem>>, vector<128x2xf32>
    tpu.vector_store %arg7[%c0_6, %c0_7], %6 {strides = array<i32>} : memref<128x2xf32, #tpu.memory_space<vmem>>, vector<128x2xf32>,
    %8 = vector.extract_strided_slice %5 {offsets = [0, 0], sizes = [1, 32], strides = [1, 1]} : vector<2x32xf32> to vector<1x32xf32>
    %c0_8 = arith.constant 0 : index
    %c0_9 = arith.constant 0 : index
    %c0_10 = arith.constant 0 : index
    %9 = vector.load %arg2[%c0_8, %c0_9, %c0_10] : memref<8x2x32xf32, #tpu.memory_space<vmem>>, vector<8x1x32xf32>
    %10 = vector.shape_cast %9 : vector<8x1x32xf32> to vector<8x32xf32>
    %c0_11 = arith.constant 0 : index
    %c0_12 = arith.constant 0 : index
    %11 = vector.load %arg4[%c0_11, %c0_12] : memref<32x32xf32, #tpu.memory_space<vmem>>, vector<32x32xf32>
    %cst_13 = arith.constant dense<0.000000e+00> : vector<8x32xf32>
    %12 = tpu.matmul %10, %11, %cst_13 {dimension_numbers = #tpu.dot_dimension_numbers<[1], [0], [0], [1], [0, 0, 1, 1], [], []>} : vector<8x32xf32>, vector<32x32xf32>, vector<8x32xf32> -> vector<8x32xf32>
    %13 = vector.broadcast %8 : vector<1x32xf32> to vector<8x32xf32>
    %14 = arith.addf %12, %13 : vector<8x32xf32>
    %15 = math.tanh %14 : vector<8x32xf32>
    %cst_14 = arith.constant dense<0.000000e+00> : vector<8xf32>
    %16 = vector.multi_reduction <add>, %15, %cst_14 [1] : vector<8x32xf32> to vector<8xf32>
    %17 = vector.shape_cast %16 : vector<8xf32> to vector<8x1xf32>
    %c0_15 = arith.constant 0 : index
    %c0_16 = arith.constant 0 : index
    %18 = vector.load %arg7[%c0_15, %c0_16] : memref<128x2xf32, #tpu.memory_space<vmem>>, vector<8x1xf32>
    tpu.vector_store %arg7[%c0_15, %c0_16], %17 {strides = array<i32>} : memref<128x2xf32, #tpu.memory_space<vmem>>, vector<8x1xf32>,
    %19 = vector.extract_strided_slice %5 {offsets = [1, 0], sizes = [1, 32], strides = [1, 1]} : vector<2x32xf32> to vector<1x32xf32>
    %c0_17 = arith.constant 0 : index
    %c1 = arith.constant 1 : index
    %c0_18 = arith.constant 0 : index
    %20 = vector.load %arg2[%c0_17, %c1, %c0_18] : memref<8x2x32xf32, #tpu.memory_space<vmem>>, vector<8x1x32xf32>
    %21 = vector.shape_cast %20 : vector<8x1x32xf32> to vector<8x32xf32>
    %c0_19 = arith.constant 0 : index
    %c0_20 = arith.constant 0 : index
    %22 = vector.load %arg4[%c0_19, %c0_20] : memref<32x32xf32, #tpu.memory_space<vmem>>, vector<32x32xf32>
    %cst_21 = arith.constant dense<0.000000e+00> : vector<8x32xf32>
    %23 = tpu.matmul %21, %22, %cst_21 {dimension_numbers = #tpu.dot_dimension_numbers<[1], [0], [0], [1], [0, 0, 1, 1], [], []>} : vector<8x32xf32>, vector<32x32xf32>, vector<8x32xf32> -> vector<8x32xf32>
    %24 = vector.broadcast %19 : vector<1x32xf32> to vector<8x32xf32>
    %25 = arith.addf %23, %24 : vector<8x32xf32>
    %26 = math.tanh %25 : vector<8x32xf32>
    %cst_22 = arith.constant dense<0.000000e+00> : vector<8xf32>
    %27 = vector.multi_reduction <add>, %26, %cst_22 [1] : vector<8x32xf32> to vector<8xf32>
    %28 = vector.shape_cast %27 : vector<8xf32> to vector<8x1xf32>
    %c0_23 = arith.constant 0 : index
    %c1_24 = arith.constant 1 : index
    %29 = vector.load %arg7[%c0_23, %c1_24] : memref<128x2xf32, #tpu.memory_space<vmem>>, vector<8x1xf32>
    tpu.vector_store %arg7[%c0_23, %c1_24], %28 {strides = array<i32>} : memref<128x2xf32, #tpu.memory_space<vmem>>, vector<8x1xf32>,
    %c0_25 = arith.constant 0 : index
    %c0_26 = arith.constant 0 : index
    %30 = vector.load %arg7[%c0_25, %c0_26] : memref<128x2xf32, #tpu.memory_space<vmem>>, vector<128x2xf32>
    %31 = tpu.transpose %30, [1, 0] : vector<128x2xf32> -> vector<2x128xf32>
    %32 = tpu.iota {dimensions = array<i32: 1>} : vector<2x128xi32>
    %c8_i32 = arith.constant 8 : i32
    %33 = vector.broadcast %c8_i32 : i32 to vector<2x128xi32>
    %34 = arith.cmpi slt, %32, %33 : vector<2x128xi32>
    %cst_27 = arith.constant -1.000000e+30 : f32
    %35 = vector.broadcast %cst_27 : f32 to vector<2x128xf32>
    %36 = arith.select %34, %31, %35 : vector<2x128xi1>, vector<2x128xf32>
    %cst_28 = arith.constant dense<0xFF800000> : vector<2xf32>
    %37 = vector.multi_reduction <maximumf>, %36, %cst_28 [1] : vector<2x128xf32> to vector<2xf32>
    %38 = vector.shape_cast %37 : vector<2xf32> to vector<2x1xf32>
    %39 = vector.broadcast %38 : vector<2x1xf32> to vector<2x128xf32>
    %40 = arith.subf %36, %39 : vector<2x128xf32>
    %41 = math.exp %40 : vector<2x128xf32>
    %cst_29 = arith.constant 0.000000e+00 : f32
    %42 = vector.broadcast %cst_29 : f32 to vector<2x128xf32>
    %43 = arith.select %34, %41, %42 : vector<2x128xi1>, vector<2x128xf32>
    %cst_30 = arith.constant dense<0.000000e+00> : vector<2xf32>
    %44 = vector.multi_reduction <add>, %43, %cst_30 [1] : vector<2x128xf32> to vector<2xf32>
    %45 = vector.shape_cast %44 : vector<2xf32> to vector<2x1xf32>
    %46 = vector.broadcast %45 : vector<2x1xf32> to vector<2x128xf32>
    %47 = arith.divf %43, %46 : vector<2x128xf32>
    %c0_31 = arith.constant 0 : index
    %c0_32 = arith.constant 0 : index
    %48 = vector.load %arg6[%c0_31, %c0_32] : memref<2x128xf32, #tpu.memory_space<vmem>>, vector<2x128xf32>
    tpu.vector_store %arg6[%c0_31, %c0_32], %47 {strides = array<i32>} : memref<2x128xf32, #tpu.memory_space<vmem>>, vector<2x128xf32>,
    return
  }
  func.func @transform_0(%arg0: i32) -> (i32, i32) {
    %c0_i32 = arith.constant 0 : i32
    %c0_i32_0 = arith.constant 0 : i32
    return %arg0, %c0_i32 : i32, i32
  }
  func.func @transform_1(%arg0: i32) -> (i32, i32, i32) {
    %c0_i32 = arith.constant 0 : i32
    %c0_i32_0 = arith.constant 0 : i32
    %c0_i32_1 = arith.constant 0 : i32
    return %c0_i32, %arg0, %c0_i32_0 : i32, i32, i32
  }
  func.func @transform_2(%arg0: i32) -> (i32, i32) {
    %c0_i32 = arith.constant 0 : i32
    %c0_i32_0 = arith.constant 0 : i32
    %c0_i32_1 = arith.constant 0 : i32
    return %c0_i32, %c0_i32_0 : i32, i32
  }
  func.func @transform_3(%arg0: i32) -> (i32, i32) {
    %c0_i32 = arith.constant 0 : i32
    %c0_i32_0 = arith.constant 0 : i32
    %c0_i32_1 = arith.constant 0 : i32
    return %c0_i32, %c0_i32_0 : i32, i32
  }
  func.func @transform_4(%arg0: i32) -> (i32, i32) {
    %c0_i32 = arith.constant 0 : i32
    %c0_i32_0 = arith.constant 0 : i32
    %c0_i32_1 = arith.constant 0 : i32
    return %c0_i32, %c0_i32_0 : i32, i32
  }
  func.func @transform_5(%arg0: i32) -> (i32, i32) {
    %c0_i32 = arith.constant 0 : i32
    %c0_i32_0 = arith.constant 0 : i32
    return %arg0, %c0_i32 : i32, i32
  }
}

</mosaic_0001>

<bundles_post_ra>
// kernel: tpu_custom_call.1
= control target key start
LH: loop header
LB: loop body
LE: loop exit
PB: predicated region body
PF: predicated region fallthrough
CT: control target
= control target key end

     0   :  { %10 = vsyncpa [#allocation4], 0  ;;  %s818_s0 = inlined_call_operand.hbm [shape: f32[2,32], index: 0, kind: input, shape index: {}]   ;;  %s819_s1 = inlined_call_operand.hbm [shape: f32[8,2,32], index: 1, kind: input, shape index: {}]   ;;  %s820_s2 = inlined_call_operand.hbm [shape: f32[32,32], index: 2, kind: input, shape index: {}]   ;;  %s821_s3 = inlined_call_operand.hbm [shape: f32[32,32], index: 3, kind: input, shape index: {}]   ;;  %s822_s4 = inlined_call_operand.vmem [shape: f32[1,32], index: 4, kind: input, shape index: {}]   ;;  %s823_s5 = inlined_call_operand.hbm [shape: f32[2,128], index: 5, kind: output, shape index: {}]  }
   0x1   :  { %11 = vsyncpa [#allocation7], 0 }
   0x2   :  { %12 = vsyncpa [#allocation10], 0 }
   0x3   :  { %13 = vsyncpa [#allocation5], 0  ;;  %s678_s18 = smov [#allocation6]  }
   0x4   :  { %s29_s19 = sshll.u32 %s678_s18, 4  ;;  %s30_s19 = int_to_ptr.vmem [resolvable:$true] %s29_s19 }
   0x5   :  { %s578_s20 = scalar_lea.vmem %s30_s19, 256  ;;  %p583_p1 = scmp.lt.s32.totalorder %s30_s19, %s30_s19 }
   0x6   :  { %p579_p0 = scmp.ne.s32.totalorder %s30_s19, %s578_s20  ;;  %p584_p2 = scmp.lt.s32.totalorder %s578_s20, %s578_s20 }
   0x8   :  { %p585_p3 = por %p584_p2, %p583_p1 }
   0xa   :  { %p586_p4 = pnand %p585_p3, %p579_p0 }
   0xc   :  { %589 = shalt.err (!%p586_p4)
}
   0xd   :  { %s679_s21 = smov 32   ;;  %s680_s22 = smov 2  }
   0xe   :  { %35 = dma.hbm_to_vmem [thread:$0]  %s819_s1, 256, %s30_s19, [#allocation7], %s679_s21, %s679_s21, %s680_s22  }
   0xf   :  { %s681_s25 = smov [#allocation3]   ;;  %s682_s27 = smov [#allocation8]  }
  0x10   :  { %s20_s26 = sshll.u32 %s681_s25, 4  ;;  %s41_s28 = sshll.u32 %s682_s27, 4  ;;  %s21_s26 = int_to_ptr.vmem [resolvable:$true] %s20_s26  ;;  %s42_s28 = int_to_ptr.vmem [resolvable:$true] %s41_s28 }
  0x11   :  { %s598_s29 = scalar_lea.vmem %s21_s26, 32  ;;  %p603_p6 = scmp.lt.s32.totalorder %s21_s26, %s21_s26 }
  0x12   :  { %p599_p5 = scmp.ne.s32.totalorder %s21_s26, %s598_s29  ;;  %p604_p7 = scmp.lt.s32.totalorder %s598_s29, %s598_s29 }
  0x14   :  { %p605_p8 = por %p604_p7, %p603_p6 }
  0x16   :  { %p606_p9 = pnand %p605_p8, %p599_p5 }
  0x18   :  { %609 = shalt.err (!%p606_p9)
}
  0x19   :  { %23 = dma.hbm_to_vmem [thread:$0]  %s818_s0, 32, %s21_s26, [#allocation4]  }
  0x1a   :  { %s618_s7 = scalar_lea.vmem %s42_s28, 512  ;;  %p623_p11 = scmp.lt.s32.totalorder %s42_s28, %s42_s28 }
  0x1b   :  { %p619_p10 = scmp.ne.s32.totalorder %s42_s28, %s618_s7  ;;  %p624_p12 = scmp.lt.s32.totalorder %s618_s7, %s618_s7 }
  0x1d   :  { %p625_p13 = por %p624_p12, %p623_p11 }
  0x1f   :  { %p626_p0 = pnand %p625_p13, %p619_p10 }
  0x21   :  { %629 = shalt.err (!%p626_p0)
}
  0x22   :  { %s683_s1 = smov 128   ;;  %s684_s8 = smov 8  }
  0x23   :  { %47 = dma.hbm_to_vmem [thread:$0]  %s820_s2, 512, %s42_s28, [#allocation7], %s683_s1, %s683_s1, %s684_s8  }
  0x24   :  { %s685_s11 = smov [#allocation9]  }
  0x25   :  { %s53_s12 = sshll.u32 %s685_s11, 4  ;;  %s54_s12 = int_to_ptr.vmem [resolvable:$true] %s53_s12 }
  0x26   :  { %s638_s13 = scalar_lea.vmem %s54_s12, 512  ;;  %p643_p2 = scmp.lt.s32.totalorder %s54_s12, %s54_s12 }
  0x27   :  { %p639_p1 = scmp.ne.s32.totalorder %s54_s12, %s638_s13  ;;  %p644_p3 = scmp.lt.s32.totalorder %s638_s13, %s638_s13 }
  0x29   :  { %p645_p4 = por %p644_p3, %p643_p2 }
  0x2b   :  { %p646_p5 = pnand %p645_p4, %p639_p1 }
  0x2d   :  { %649 = shalt.err (!%p646_p5)
}
  0x2e   :  { %59 = dma.hbm_to_vmem [thread:$0]  %s821_s3, 512, %s54_s12, [#allocation10], %s683_s1, %s683_s1, %s684_s8  }
  0x2f   :  { %670 = dma.done.wait [#allocation4], 32  }
  0x30   :  { %671 = vsyncadd [#allocation4], 4294967264 }
  0x31   :  { %672 = dma.done.wait [#allocation7], 768  }
  0x32   :  { %673 = vsyncadd [#allocation7], 4294966528 }
  0x33   :  { %674 = dma.done.wait [#allocation10], 512  }
  0x34   :  { %675 = vsyncadd [#allocation10], 4294966784  ;;  %v686_v0 = vmov 0.0   ;;  %vm687_vm0 = vmmov 0   ;;  %v78_v1 = vld [vmem:[#allocation8 + $0x18] sm:$0xff]  ;;  %v77_v2 = vld [vmem:[#allocation8 + $0x10] sm:$0xff]  ;;  %v189_v54 = vlaneseq }
  0x35   :  { %518 = vmatprep.subr.mxu0 %v686_v0  ;;  %529 = vmatprep.subr.mxu1 %v686_v0  ;;  %v188_v3 = vld [vmem:[#allocation9 + $0x18] sm:$0xff]  ;;  %v76_v4 = vld [vmem:[#allocation8 + $0x8] sm:$0xff]  ;;  %v737_v5 = vld [vmem:[#allocation9 + $0x10] sm:$0xff]  ;;  %vm86_vm1 = vcmask 261120   ;;  %vm202_vm2 = vcmask 1041409   ;;  %vm205_vm3 = vcmask 1042434  }
  0x36   :  { %526 = vmatprep.mubr.msk.f32.mxu0 %vm687_vm0, %v686_v0  ;;  %537 = vmatprep.mubr.msk.f32.mxu1 %vm687_vm0, %v686_v0  ;;  %vm208_vm4 = vcmask 1043459   ;;  %v75_v6 = vld [vmem:[#allocation8] sm:$0xff]  ;;  %v741_v7 = vld [vmem:[#allocation9 + $0x8] sm:$0xff]  ;;  %vm211_vm5 = vcmask 1044484   ;;  %vm214_vm6 = vcmask 1045509   ;;  %vm217_vm7 = vcmask 1046534  }
  0x37   :  { %519 = vmatpush3.msra.mxu0 %v78_v1  ;;  %530 = vmatpush3.msra.mxu1 %v188_v3  ;;  %v743_v8 = vld [vmem:[#allocation9] sm:$0xff]  ;;  %v177_v9 = vld [vmem:[#allocation6] sm:$0x1]  ;;  %v178_v10 = vld [vmem:[#allocation6 + $0x2] sm:$0x1]  ;;  %vm220_vm8 = vcmask 1047559  }
  0x38   :  { %520 = vmatprep.subr.mxu0 %v686_v0  ;;  %531 = vmatprep.subr.mxu1 %v686_v0  ;;  %v179_v11 = vld [vmem:[#allocation6 + $0x4] sm:$0x1]  ;;  %v180_v12 = vld [vmem:[#allocation6 + $0x6] sm:$0x1]  ;;  %v181_v13 = vld [vmem:[#allocation6 + $0x8] sm:$0x1] }
  0x39   :  { %521 = vmatpush3.msra.mxu0 %v77_v2  ;;  %532 = vmatpush3.msra.mxu1 %v737_v5  ;;  %v182_v14 = vld [vmem:[#allocation6 + $0xa] sm:$0x1]  ;;  %v74_v15 = vld [vmem:[#allocation3] sm:$0x3]  ;;  %v183_v16 = vld [vmem:[#allocation6 + $0xc] sm:$0x1] }
  0x3a   :  { %522 = vmatprep.subr.mxu0 %v686_v0  ;;  %533 = vmatprep.subr.mxu1 %v686_v0  ;;  %v201_v17 = vrot.slane %v178_v10, 7  ;;  %v204_v18 = vrot.slane %v179_v11, 6  ;;  %v184_v19 = vld [vmem:[#allocation6 + $0xe] sm:$0x1]  ;;  %v207_v20 = vrot.slane %v180_v12, 5  ;;  %v210_v21 = vrot.slane %v181_v13, 4 }
  0x3b   :  { %523 = vmatpush3.msra.mxu0 %v76_v4  ;;  %534 = vmatpush3.msra.mxu1 %v741_v7  ;;  %v213_v22 = vrot.slane %v182_v14, 3  ;;  %v216_v23 = vrot.slane %v183_v16, 2  ;;  %v300_v25 = vld [vmem:[#allocation6 + $0x1] sm:$0x1]  ;;  %v301_v26 = vld [vmem:[#allocation6 + $0x3] sm:$0x1] }
  0x3c   :  { %524 = vmatprep.subr.mxu0 %v686_v0  ;;  %535 = vmatprep.subr.mxu1 %v686_v0  ;;  %v203_v24 = vsel %vm202_vm2, %v201_v17, %v177_v9  ;;  %v302_v27 = vld [vmem:[#allocation6 + $0x5] sm:$0x1]  ;;  %v303_v29 = vld [vmem:[#allocation6 + $0x7] sm:$0x1]  ;;  %v304_v30 = vld [vmem:[#allocation6 + $0x9] sm:$0x1] }
  0x3d   :  { %525 = vmatpush3.msra.mxu0 %v75_v6  ;;  %536 = vmatpush3.msra.mxu1 %v743_v8  ;;  %v206_v28 = vsel %vm205_vm3, %v204_v18, %v203_v24  ;;  %v305_v31 = vld [vmem:[#allocation6 + $0xb] sm:$0x1]  ;;  %v219_v33 = vrot.slane %v184_v19, 1  ;;  %v306_v34 = vld [vmem:[#allocation6 + $0xd] sm:$0x1]  ;;  %v324_v35 = vrot.slane %v301_v26, 7 }
  0x3e   :  { %527 = vmatmul.mubr.msk.f32.vlgmr.msra.gmra.mxu0 %vm86_vm1, %v74_v15  ;;  %540 = vmatprep.subr.mxu0 %v686_v0  ;;  %v209_v32 = vsel %vm208_vm4, %v207_v20, %v206_v28  ;;  %v326_v36 = vrot.slane %v302_v27, 6  ;;  %v307_v38 = vld [vmem:[#allocation6 + $0xf] sm:$0x1]  ;;  %v328_v39 = vrot.slane %v303_v29, 5  ;;  %v330_v40 = vrot.slane %v304_v30, 4 }
  0x3f   :  { %541 = vmatpush3.msra.mxu0 %v188_v3  ;;  %548 = vmatprep.mubr.msk.f32.mxu0 %vm687_vm0, %v686_v0  ;;  %v212_v37 = vsel %vm211_vm5, %v210_v21, %v209_v32  ;;  %v325_v42 = vsel %vm202_vm2, %v324_v35, %v300_v25  ;;  %v332_v43 = vrot.slane %v305_v31, 3  ;;  %v334_v46 = vrot.slane %v306_v34, 2  ;;  %v499_v56 = vld [vmem:[%s822_s4] ss:$0 sm:$0xff]  ;;  %s688_s4 = smov [#allocation11]  }
  0x40   :  { %542 = vmatprep.subr.mxu0 %v686_v0  ;;  %v215_v41 = vsel %vm214_vm6, %v213_v22, %v212_v37  ;;  %v327_v45 = vsel %vm205_vm3, %v326_v36, %v325_v42  ;;  %v336_v49 = vrot.slane %v307_v38, 1  ;;  %vm160_vm9 = vcmask 15360   ;;  %s488_s15 = sshll.u32 %s688_s4, 4  ;;  %s489_s15 = int_to_ptr.vmem [resolvable:$true] %s488_s15 }
  0x41   :  { %543 = vmatpush3.msra.mxu0 %v737_v5  ;;  %v218_v44 = vsel %vm217_vm7, %v216_v23, %v215_v41  ;;  %v329_v48 = vsel %vm208_vm4, %v328_v39, %v327_v45  ;;  %161 = vst.msk [vmem:[#allocation2] sm:$0xff] %vm160_vm9, %v686_v0  ;;  %162 = vst.msk [vmem:[#allocation2 + $0x8] sm:$0xff] %vm160_vm9, %v686_v0  ;;  %v190_v55 = vshrl.u32 %v189_v54, 7  ;;  %vm298_vm10 = vcmask 7168   ;;  %s650_s16 = scalar_lea.vmem %s489_s15, 32  ;;  %p655_p7 = scmp.lt.s32.totalorder %s489_s15, %s489_s15 }
  0x42   :  { %544 = vmatprep.subr.mxu0 %v686_v0  ;;  %v221_v47 = vsel %vm220_vm8, %v219_v33, %v218_v44  ;;  %v331_v50 = vsel %vm211_vm5, %v330_v40, %v329_v48  ;;  %163 = vst.msk [vmem:[#allocation2 + $0x10] sm:$0xff] %vm160_vm9, %v686_v0  ;;  %164 = vst.msk [vmem:[#allocation2 + $0x18] sm:$0xff] %vm160_vm9, %v686_v0  ;;  %vm414_vm11 = vcmask 15368   ;;  %v465_v28 = vand.u32 127, %v189_v54  ;;  %p651_p6 = scmp.ne.s32.totalorder %s489_s15, %s650_s16  ;;  %p656_p8 = scmp.lt.s32.totalorder %s650_s16, %s650_s16 }
  0x43   :  { %545 = vmatpush3.msra.mxu0 %v741_v7  ;;  %538 = vmatmul.mubr.msk.f32.vlgmr.msra.gmra.mxu1 %vm86_vm1, %v221_v47  ;;  %v333_v51 = vsel %vm214_vm6, %v332_v43, %v331_v50  ;;  %165 = vst.msk [vmem:[#allocation2 + $0x20] sm:$0xff] %vm160_vm9, %v686_v0  ;;  %166 = vst.msk [vmem:[#allocation2 + $0x28] sm:$0xff] %vm160_vm9, %v686_v0  ;;  %v191_v57 = vsub.s32 0, %v190_v55  ;;  %v314_v62 = vsub.s32 1, %v190_v55  ;;  %vm468_vm13 = vcmask 1041408  }
  0x44   :  { %546 = vmatprep.subr.mxu0 %v686_v0  ;;  %v335_v52 = vsel %vm217_vm7, %v334_v46, %v333_v51  ;;  %167 = vst.msk [vmem:[#allocation2 + $0x30] sm:$0xff] %vm160_vm9, %v686_v0  ;;  %168 = vst.msk [vmem:[#allocation2 + $0x38] sm:$0xff] %vm160_vm9, %v686_v0  ;;  %vm466_vm12 = vcmp.lt.s32.totalorder %v465_v28, 8  ;;  %p657_p9 = por %p656_p8, %p655_p7 }
  0x45   :  { %547 = vmatpush3.msra.mxu0 %v743_v8  ;;  %v337_v53 = vsel %vm220_vm8, %v336_v49, %v335_v52  ;;  %169 = vst.msk [vmem:[#allocation2 + $0x40] sm:$0xff] %vm160_vm9, %v686_v0  ;;  %170 = vst.msk [vmem:[#allocation2 + $0x48] sm:$0xff] %vm160_vm9, %v686_v0 }
  0x46   :  { %549 = vmatmul.mubr.msk.f32.vlgmr.msra.gmra.mxu0 %vm86_vm1, %v337_v53  ;;  %171 = vst.msk [vmem:[#allocation2 + $0x50] sm:$0xff] %vm160_vm9, %v686_v0  ;;  %172 = vst.msk [vmem:[#allocation2 + $0x58] sm:$0xff] %vm160_vm9, %v686_v0  ;;  %p658_p10 = pnand %p657_p9, %p651_p6 }
  0x47   :  { %173 = vst.msk [vmem:[#allocation2 + $0x60] sm:$0xff] %vm160_vm9, %v686_v0  ;;  %174 = vst.msk [vmem:[#allocation2 + $0x68] sm:$0xff] %vm160_vm9, %v686_v0 }
  0x48   :  { %175 = vst.msk [vmem:[#allocation2 + $0x70] sm:$0xff] %vm160_vm9, %v686_v0  ;;  %176 = vst.msk [vmem:[#allocation2 + $0x78] sm:$0xff] %vm160_vm9, %v686_v0  ;;  %v417_v13 = vld [vmem:[#allocation2 + $0x8] sm:$0xff] }
  0x49   :  { %v418_v14 = vld [vmem:[#allocation2 + $0x10] sm:$0xff]  ;;  %v419_v15 = vld [vmem:[#allocation2 + $0x18] sm:$0xff] }
  0x4a   :  { %v420_v16 = vld [vmem:[#allocation2 + $0x20] sm:$0xff]  ;;  %v421_v17 = vld [vmem:[#allocation2 + $0x28] sm:$0xff] }
  0x4b   :  { %v422_v18 = vld [vmem:[#allocation2 + $0x30] sm:$0xff]  ;;  %v423_v19 = vld [vmem:[#allocation2 + $0x38] sm:$0xff] }
  0x4c   :  { %v424_v20 = vld [vmem:[#allocation2 + $0x40] sm:$0xff]  ;;  %v425_v21 = vld [vmem:[#allocation2 + $0x48] sm:$0xff] }
  0x4d   :  { %v426_v22 = vld [vmem:[#allocation2 + $0x50] sm:$0xff]  ;;  %v427_v23 = vld [vmem:[#allocation2 + $0x58] sm:$0xff] }
  0x4e   :  { %v428_v24 = vld [vmem:[#allocation2 + $0x60] sm:$0xff]  ;;  %v429_v25 = vld [vmem:[#allocation2 + $0x68] sm:$0xff] }
  0x4f   :  { %v430_v26 = vld [vmem:[#allocation2 + $0x70] sm:$0xff]  ;;  %v431_v27 = vld [vmem:[#allocation2 + $0x78] sm:$0xff] }
  0xfe   :  { %v156_v58 = vpop.f32.mrf.mxu0 }
  0xff   :  { %v157_v59 = vadd.f32 %v499_v56, %v156_v58 }
 0x100   :  { %v528_v60 = vpop.f32.mrf.mxu0 }
 0x101   :  { %v192_v61 = vrot.slane %v157_v59, %v191_v57  ;;  %v315_v3 = vrot.slane %v157_v59, %v314_v62 }
 0x103   :  { %v290_v63 = vpop.f32.mrf.mxu1 }
 0x104   :  { %v291_v1 = vadd.f32 %v290_v63, %v192_v61 }
 0x105   :  { %v539_v2 = vpop.f32.mrf.mxu1 }
 0x106   :  { %562 = vtanh.f32 %v291_v1  ;;  %v406_v4 = vpop.f32.mrf.mxu0 }
 0x107   :  { %v407_v5 = vadd.f32 %v406_v4, %v315_v3 }
 0x108   :  { %v550_v0 = vpop.f32.mrf.mxu0 }
 0x109   :  { %564 = vtanh.f32 %v407_v5 }
 0x113   :  { %v563_v6 = vpop.eup %562 }
 0x114   :  { %v295_v7 = vsel %vm86_vm1, %v563_v6, 0.0 }
 0x115   :  { %296 = vadd.xlane.f32.xlu0 %v295_v7 }
 0x116   :  { %v565_v8 = vpop.eup %564 }
 0x117   :  { %v411_v9 = vsel %vm86_vm1, %v565_v8, 0.0 }
 0x119   :  { %412 = vadd.xlane.f32.xlu0 %v411_v9 }
 0x19e   :  { %v297_v10 = vpop.xlane.xlu0 %296 }
 0x19f   :  { %299 = vst.msk [vmem:[#allocation2] sm:$0xff] %vm298_vm10, %v297_v10 }
 0x1a2   :  { %v413_v11 = vpop.xlane.xlu0 %412 }
 0x1a3   :  { %415 = vst.msk [vmem:[#allocation2] sm:$0xff] %vm414_vm11, %v413_v11 }
 0x1aa   :  { %v416_v12 = vld [vmem:[#allocation2] sm:$0xff] }
 0x1ab   :  { %432 = vxpose.xlu1.b32.start [1/16] (narrow) %v416_v12, 8 }
 0x1af   :  { %433 = vxpose.xlu1.b32.cont [2/16] (narrow) %v417_v13, 8 }
 0x1b3   :  { %434 = vxpose.xlu1.b32.cont [3/16] (narrow) %v418_v14, 8 }
 0x1b7   :  { %435 = vxpose.xlu1.b32.cont [4/16] (narrow) %v419_v15, 8 }
 0x1bb   :  { %436 = vxpose.xlu1.b32.cont [5/16] (narrow) %v420_v16, 8 }
 0x1bf   :  { %437 = vxpose.xlu1.b32.cont [6/16] (narrow) %v421_v17, 8 }
 0x1c3   :  { %438 = vxpose.xlu1.b32.cont [7/16] (narrow) %v422_v18, 8 }
 0x1c7   :  { %439 = vxpose.xlu1.b32.cont [8/16] (narrow) %v423_v19, 8 }
 0x1cb   :  { %440 = vxpose.xlu1.b32.cont [9/16] (narrow) %v424_v20, 8 }
 0x1cf   :  { %441 = vxpose.xlu1.b32.cont [10/16] (narrow) %v425_v21, 8 }
 0x1d3   :  { %442 = vxpose.xlu1.b32.cont [11/16] (narrow) %v426_v22, 8 }
 0x1d7   :  { %443 = vxpose.xlu1.b32.cont [12/16] (narrow) %v427_v23, 8 }
 0x1db   :  { %444 = vxpose.xlu1.b32.cont [13/16] (narrow) %v428_v24, 8 }
 0x1df   :  { %445 = vxpose.xlu1.b32.cont [14/16] (narrow) %v429_v25, 8 }
 0x1e3   :  { %446 = vxpose.xlu1.b32.cont [15/16] (narrow) %v430_v26, 8 }
 0x1e7   :  { %447 = vxpose.xlu1.b32.end [16/16] (narrow) %v431_v27, 8 }
 0x227   :  { %v448_v29 = vpop.trf.xlu1 }
 0x228   :  { %v467_v30 = vsel %vm466_vm12, %v448_v29, -1e+30 }
 0x229   :  { %v469_v31 = vsel %vm468_vm13, %v467_v30, -inf }
 0x22a   :  { %470 = vmax.xlane.f32.xlu0 %v469_v31 }
 0x2b3   :  { %v471_v32 = vpop.xlane.xlu0 %470 }
 0x2b4   :  { %v472_v33 = vsub.f32 %v467_v30, %v471_v32 }
 0x2b6   :  { %v473_v34 = vmul.f32 1.442695, %v472_v33 }
 0x2b8   :  { %566 = vpow2.f32 %v473_v34 }
 0x2c5   :  { %v567_v35 = vpop.eup %566 }
 0x2c6   :  { %v475_v36 = vsel %vm466_vm12, %v567_v35, 0.0 }
 0x2c7   :  { %v476_v37 = vsel %vm468_vm13, %v475_v36, 0.0 }
 0x2c8   :  { %477 = vadd.xlane.f32.xlu0 %v476_v37 }
 0x351   :  { %v478_v38 = vpop.xlane.xlu0 %477 }
 0x352   :  { %568 = vrcp.f32 %v478_v38 }
 0x35f   :  { %v569_v39 = vpop.eup %568 }
 0x360   :  { %v480_v40 = vmul.f32 %v569_v39, %v475_v36 }
 0x362   :  { %481 = vst [vmem:[#allocation11] sm:$0x3] %v480_v40 }
 0x363   :  { %661 = shalt.err (!%p658_p10)
}
 0x364   :  { %491 = dma.vmem_to_hbm [thread:$0]  %s489_s15, 32, %s823_s5, [#allocation5]  }
 0x365   :  { %676 = dma.done.wait [#allocation5], 32  }
 0x366   :  { %677 = vsyncadd [#allocation5], 4294967264 }
 0x367   :  { %495 = vsyncpa [#allocation4], 1 }
 0x368   :  { %496 = vsyncpa [#allocation7], 1 }
 0x369   :  { %497 = vsyncpa [#allocation10], 1 }
 0x36a   :  { %498 = vsyncpa [#allocation5], 1 }

</bundles_post_ra>
